<compile_context>
chip_gen: v6e
topology: v6e:2x2x1
jax: 0.10.0
libtpu: 0.0.40
codegen_flags: <defaults>
</compile_context>

<pallas_src>
import jax
import jax.numpy as jnp
from jax.experimental import pallas as pl
from jax.experimental.pallas import tpu as pltpu


def _sq_kernel(x_ref, o_ref):
    # Elementwise square on the whole VMEM tile (VPU op).
    x = x_ref[...]
    o_ref[...] = x * x


def sq_pallas(x: jax.Array) -> jax.Array:
    """Elementwise square via a Pallas TPU kernel. Matches torch `x ** 2`."""
    orig_shape = x.shape
    dtype = x.dtype
    total = x.size
    if total == 0:
        return x

    itemsize = jnp.dtype(dtype).itemsize

    # Lane width: prefer a wide, unmasked last dim for mem-bound streaming.
    lane_w = 1024 if total >= 8 * 1024 else 128

    # Rows per tile: target ~2 MiB per tile, multiple of 8 sublanes.
    tile_bytes = 2 * 1024 * 1024
    r_tile = max(8, (tile_bytes // (lane_w * itemsize)) // 8 * 8)

    # Pad so the slab is (rows, lane_w) with rows a multiple of 8, and a
    # multiple of r_tile when the input is large (avoids partial edge blocks).
    rows = pl.cdiv(pl.cdiv(total, lane_w), 8) * 8
    if rows > r_tile:
        rows = pl.cdiv(rows, r_tile) * r_tile
    else:
        r_tile = rows  # small input: single full-array block

    padded_total = rows * lane_w
    flat = x.reshape(-1)
    if padded_total != total:
        flat = jnp.pad(flat, (0, padded_total - total))
    x2d = flat.reshape(rows, lane_w)

    grid = (rows // r_tile,)

    out2d = pl.pallas_call(
        _sq_kernel,
        out_shape=jax.ShapeDtypeStruct((rows, lane_w), dtype),
        grid_spec=pl.GridSpec(
            grid=grid,
            in_specs=[pl.BlockSpec((r_tile, lane_w), lambda i: (i, 0))],
            out_specs=pl.BlockSpec((r_tile, lane_w), lambda i: (i, 0)),
        ),
        compiler_params=pltpu.CompilerParams(
            dimension_semantics=("parallel",),
        ),
    )(x2d)

    out_flat = out2d.reshape(-1)
    if padded_total != total:
        out_flat = out_flat[:total]
    return out_flat.reshape(orig_shape)


if __name__ == "__main__":
    key = jax.random.PRNGKey(0)
    # NCHW input, consistent with typical conv-module usage of this activation.
    x = jax.random.normal(key, (2, 4, 16, 16), dtype=jnp.float32)

    y = sq_pallas(x)
    jax.block_until_ready(y)

    # Reference check against plain JAX.
    y_ref = x ** 2
    assert y.shape == x.shape and y.dtype == x.dtype
    assert jnp.allclose(y, y_ref, atol=1e-6, rtol=1e-6)

    # Also exercise a larger, non-128-divisible size to cover the padded,
    # multi-tile, lane-dense (W=1024) path.
    x2 = jax.random.normal(jax.random.PRNGKey(1), (3, 5, 37, 41), dtype=jnp.float32)
    y2 = sq_pallas(x2)
    jax.block_until_ready(y2)
    assert y2.shape == x2.shape and y2.dtype == x2.dtype
    assert jnp.allclose(y2, x2 ** 2, atol=1e-6, rtol=1e-6)

    print("KERNEL_OK")
</pallas_src>

<mosaic_0001>
module attributes {stable_mosaic.version = 11 : i64} {
  func.func @_sq_kernel(%arg0: i32, %arg1: memref<16x128xf32, #tpu.memory_space<vmem>>, %arg2: memref<16x128xf32, #tpu.memory_space<vmem>>) attributes {dimension_semantics = [#tpu.dimension_semantics<parallel>], iteration_bounds = array<i64: 1>, scalar_prefetch = 0 : i64, scratch_operands = 0 : i64, tpu.core_type = #tpu.core_type<tc>, window_params = [{transform_indices = @transform_0, window_bounds = array<i64: 16, 128>}, {transform_indices = @transform_1, window_bounds = array<i64: 16, 128>}]} {
    %c0 = arith.constant 0 : index
    %c0_0 = arith.constant 0 : index
    %0 = vector.load %arg1[%c0, %c0_0] : memref<16x128xf32, #tpu.memory_space<vmem>>, vector<16x128xf32>
    %1 = arith.mulf %0, %0 : vector<16x128xf32>
    %c0_1 = arith.constant 0 : index
    %c0_2 = arith.constant 0 : index
    %2 = vector.load %arg2[%c0_1, %c0_2] : memref<16x128xf32, #tpu.memory_space<vmem>>, vector<16x128xf32>
    tpu.vector_store %arg2[%c0_1, %c0_2], %1 {strides = array<i32>} : memref<16x128xf32, #tpu.memory_space<vmem>>, vector<16x128xf32>,
    return
  }
  func.func @transform_0(%arg0: i32) -> (i32, i32) {
    %c0_i32 = arith.constant 0 : i32
    %c0_i32_0 = arith.constant 0 : i32
    return %arg0, %c0_i32 : i32, i32
  }
  func.func @transform_1(%arg0: i32) -> (i32, i32) {
    %c0_i32 = arith.constant 0 : i32
    %c0_i32_0 = arith.constant 0 : i32
    return %arg0, %c0_i32 : i32, i32
  }
}

</mosaic_0001>

<bundles_post_ra>
// kernel: tpu_custom_call.1
= control target key start
LH: loop header
LB: loop body
LE: loop exit
PB: predicated region body
PF: predicated region fallthrough
CT: control target
= control target key end

     0   :  { %6 = vsyncpa [#allocation3], 0  ;;  %s114_s0 = inlined_call_operand.hbm [shape: f32[16,128], index: 0, kind: input, shape index: {}]   ;;  %s115_s1 = inlined_call_operand.hbm [shape: f32[16,128], index: 1, kind: output, shape index: {}]  }
   0x1   :  { %7 = vsyncpa [#allocation4], 0  ;;  %s94_s6 = smov [#allocation2]  }
   0x2   :  { %s13_s7 = sshll.u32 %s94_s6, 4  ;;  %s14_s7 = int_to_ptr.vmem [resolvable:$true] %s13_s7 }
   0x3   :  { %s58_s8 = scalar_lea.vmem %s14_s7, 256  ;;  %p63_p1 = scmp.lt.s32.totalorder %s14_s7, %s14_s7 }
   0x4   :  { %p59_p0 = scmp.ne.s32.totalorder %s14_s7, %s58_s8  ;;  %p64_p2 = scmp.lt.s32.totalorder %s58_s8, %s58_s8 }
   0x6   :  { %p65_p3 = por %p64_p2, %p63_p1 }
   0x8   :  { %p66_p4 = pnand %p65_p3, %p59_p0 }
   0xa   :  { %69 = shalt.err (!%p66_p4)
}
   0xb   :  { %s95_s9 = smov 128   ;;  %s96_s10 = smov 8  }
   0xc   :  { %19 = dma.hbm_to_vmem [thread:$0]  %s114_s0, 256, %s14_s7, [#allocation3], %s95_s9, %s95_s9, %s96_s10  }
   0xd   :  { %90 = dma.done.wait [#allocation3], 256  }
   0xe   :  { %91 = vsyncadd [#allocation3], 4294967040  ;;  %s97_s13 = smov [#allocation5]   ;;  %v23_v0 = vld [vmem:[#allocation2] sm:$0xff]  ;;  %v24_v1 = vld [vmem:[#allocation2 + $0x8] sm:$0xff] }
   0xf   :  { %s34_s14 = sshll.u32 %s97_s13, 4  ;;  %v25_v2 = vmul.f32 %v23_v0, %v23_v0  ;;  %v26_v3 = vmul.f32 %v24_v1, %v24_v1  ;;  %s35_s14 = int_to_ptr.vmem [resolvable:$true] %s34_s14 }
  0x10   :  { %s70_s15 = scalar_lea.vmem %s35_s14, 256  ;;  %p75_p6 = scmp.lt.s32.totalorder %s35_s14, %s35_s14 }
  0x11   :  { %27 = vst [vmem:[#allocation5] sm:$0xff] %v25_v2  ;;  %28 = vst [vmem:[#allocation5 + $0x8] sm:$0xff] %v26_v3  ;;  %p71_p5 = scmp.ne.s32.totalorder %s35_s14, %s70_s15  ;;  %p76_p7 = scmp.lt.s32.totalorder %s70_s15, %s70_s15 }
  0x13   :  { %p77_p8 = por %p76_p7, %p75_p6 }
  0x15   :  { %p78_p9 = pnand %p77_p8, %p71_p5 }
  0x17   :  { %81 = shalt.err (!%p78_p9)
}
  0x18   :  { %40 = dma.vmem_to_hbm [thread:$0]  %s35_s14, 256, %s115_s1, [#allocation4], %s95_s9, %s95_s9, %s96_s10  }
  0x19   :  { %92 = dma.done.wait [#allocation4], 256  }
  0x1a   :  { %93 = vsyncadd [#allocation4], 4294967040 }
  0x1b   :  { %44 = vsyncpa [#allocation3], 1 }
  0x1c   :  { %45 = vsyncpa [#allocation4], 1 }

</bundles_post_ra>
